<compile_context>
chip_gen: v6e
topology: v6e:2x2x1
jax: 0.10.0
libtpu: 0.0.40
codegen_flags: <defaults>
</compile_context>

<pallas_src>
import functools

import jax
import jax.numpy as jnp
from jax import lax
from jax.experimental import pallas as pl
from jax.experimental.pallas import tpu as pltpu


# -----------------------------------------------------------------------------
# Pallas kernel: one grid step == one (batch block, time chunk)
# -----------------------------------------------------------------------------
def ealstm_kernel(xp_ref, ig_ref, whh_ref, h_out_ref, c_out_ref, h_scr, c_scr):
    """Refs (kernel view):

      xp_ref  : [ts, bb, 3H]  precomputed x_d @ W_ih + bias for this chunk (f32)
      ig_ref  : [bb, H]       static (entity-aware) input gate, grid-invariant
      whh_ref : [H, 3H]       recurrent weights (f32 or bf16)
      h_out_ref, c_out_ref : [ts, bb, H]  per-chunk output blocks
      h_scr, c_scr         : [bb, H] f32 carry, persistent across time chunks
    """
    tc = pl.program_id(1)          # time-chunk index (innermost grid axis)
    ts = xp_ref.shape[0]
    H = h_scr.shape[-1]

    @pl.when(tc == 0)
    def _init():
        h_scr[...] = jnp.zeros_like(h_scr)
        c_scr[...] = jnp.zeros_like(c_scr)

    i_gate = ig_ref[...].astype(jnp.float32)
    w_hh = whh_ref[...]

    def step(t, carry):
        h, c = carry
        # only recurrent matmul left in the hot loop; f32 accumulation
        gates = jnp.dot(h.astype(w_hh.dtype), w_hh,
                        preferred_element_type=jnp.float32) + xp_ref[t]
        # NOTE: for small H (<128) these are within-vreg lane slices; for
        # production H (multiple of 128) they are tile-aligned and free.
        f = gates[:, 0 * H:1 * H]
        o = gates[:, 1 * H:2 * H]
        g = gates[:, 2 * H:3 * H]
        c1 = jax.nn.sigmoid(f) * c + i_gate * jnp.tanh(g)
        h1 = jax.nn.sigmoid(o) * jnp.tanh(c1)
        h_out_ref[t] = h1.astype(h_out_ref.dtype)
        c_out_ref[t] = c1.astype(c_out_ref.dtype)
        return (h1, c1)

    h, c = lax.fori_loop(0, ts, step, (h_scr[...], c_scr[...]), unroll=True)
    h_scr[...] = h
    c_scr[...] = c


# -----------------------------------------------------------------------------
# Wrapper
# -----------------------------------------------------------------------------
@functools.partial(jax.jit, static_argnames=("ts", "bb", "compute_dtype"))
def ealstm_forward(x_d, x_s, w_ih, w_hh, w_sh, bias, bias_s,
                   *, ts=8, bb=None, compute_dtype=jnp.float32):
    """EA-LSTM forward.

    x_d : [B, T, Dd] (batch_first), x_s : [B, Ds]
    returns (h_n, c_n), each [B, T, H]
    """
    B, T, Dd = x_d.shape
    H = w_sh.shape[1]

    # Batch tiling must respect the (8, 128) sublane constraint; fall back to
    # the full batch if an invalid tile is requested.
    if bb is None or B % bb != 0 or bb % 8 != 0:
        bb = B
    t_chunks = pl.cdiv(T, ts)
    T_pad = t_chunks * ts

    f32 = jnp.float32

    # ---- hoisted precompute (one big MXU matmul over all timesteps) --------
    x_tm = jnp.swapaxes(x_d, 0, 1).astype(compute_dtype)            # [T, B, Dd]
    x_proj = (jnp.dot(x_tm.reshape(T * B, Dd), w_ih.astype(compute_dtype),
                      preferred_element_type=f32).reshape(T, B, 3 * H)
              + bias.astype(f32)[None, None, :])                    # [T, B, 3H]
    if T_pad != T:
        x_proj = jnp.pad(x_proj, ((0, T_pad - T), (0, 0), (0, 0)))

    # ---- hoisted static (entity-aware) input gate ---------------------------
    i_gate = jax.nn.sigmoid(
        jnp.dot(x_s.astype(f32), w_sh.astype(f32)) + bias_s.astype(f32)[None, :])

    w_hh_c = w_hh.astype(compute_dtype)

    out_shapes = (jax.ShapeDtypeStruct((T_pad, B, H), x_d.dtype),
                  jax.ShapeDtypeStruct((T_pad, B, H), x_d.dtype))

    h_tm, c_tm = pl.pallas_call(
        ealstm_kernel,
        out_shape=out_shapes,
        grid_spec=pltpu.PrefetchScalarGridSpec(
            num_scalar_prefetch=0,
            grid=(B // bb, t_chunks),
            in_specs=[
                # pre-projected dynamic input, one time chunk per grid step
                pl.BlockSpec((ts, bb, 3 * H), lambda bi, tc: (tc, bi, 0)),
                # static input gate: per batch block, time-invariant
                pl.BlockSpec((bb, H), lambda bi, tc: (bi, 0)),
                # recurrent weights: fully resident
                pl.BlockSpec((H, 3 * H), lambda bi, tc: (0, 0)),
            ],
            out_specs=[
                pl.BlockSpec((ts, bb, H), lambda bi, tc: (tc, bi, 0)),
                pl.BlockSpec((ts, bb, H), lambda bi, tc: (tc, bi, 0)),
            ],
            scratch_shapes=[
                pltpu.VMEM((bb, H), jnp.float32),   # h carry (f32)
                pltpu.VMEM((bb, H), jnp.float32),   # c carry (f32)
            ],
        ),
        compiler_params=pltpu.CompilerParams(
            # batch blocks are independent -> "parallel" (v7x 2-TC megacore);
            # time chunks carry the recurrence -> "arbitrary" (sequential)
            dimension_semantics=("parallel", "arbitrary"),
            vmem_limit_bytes=32 * 1024 * 1024),
    )(x_proj, i_gate, w_hh_c)

    # TODO(synk): for very large T*B*H, write batch-major directly from the
    # kernel to avoid this extra HBM transpose pass.
    h_n = jnp.swapaxes(h_tm[:T], 0, 1)
    c_n = jnp.swapaxes(c_tm[:T], 0, 1)
    return h_n, c_n


# -----------------------------------------------------------------------------
# Pure-JAX reference (mirrors the PyTorch forward)
# -----------------------------------------------------------------------------
def ealstm_reference(x_d, x_s, w_ih, w_hh, w_sh, bias, bias_s):
    B, T, Dd = x_d.shape
    H = w_sh.shape[1]
    i_gate = jax.nn.sigmoid(x_s @ w_sh + bias_s[None, :])
    h0 = jnp.zeros((B, H), x_d.dtype)
    c0 = jnp.zeros((B, H), x_d.dtype)

    def step(carry, x_t):
        h, c = carry
        gates = h @ w_hh + x_t @ w_ih + bias[None, :]
        f, o, g = gates[:, :H], gates[:, H:2 * H], gates[:, 2 * H:]
        c1 = jax.nn.sigmoid(f) * c + i_gate * jnp.tanh(g)
        h1 = jax.nn.sigmoid(o) * jnp.tanh(c1)
        return (h1, c1), (h1, c1)

    (_, _), (h_seq, c_seq) = lax.scan(step, (h0, c0),
                                      jnp.transpose(x_d, (1, 0, 2)))
    return jnp.transpose(h_seq, (1, 0, 2)), jnp.transpose(c_seq, (1, 0, 2))


# -----------------------------------------------------------------------------
# Deterministic parameter init (mirrors EALSTM.reset_parameters shapes)
# -----------------------------------------------------------------------------
def orthogonal_init(key, rows, cols, dtype=jnp.float32):
    n = max(rows, cols)
    a = jax.random.normal(key, (n, min(rows, cols)), dtype)
    q, _ = jnp.linalg.qr(a)
    q = q[:rows, :] if rows >= cols else q[:cols, :].T
    return q.astype(dtype)


def make_params(key, input_size_dyn, input_size_stat, hidden_size,
                initial_forget_bias=0):
    k1, k2 = jax.random.split(key)
    w_ih = orthogonal_init(k1, input_size_dyn, 3 * hidden_size)
    w_sh = orthogonal_init(k2, input_size_stat, hidden_size)
    w_hh = jnp.tile(jnp.eye(hidden_size, dtype=jnp.float32), (1, 3))
    bias = jnp.zeros((3 * hidden_size,), jnp.float32)
    if initial_forget_bias != 0:
        bias = bias.at[:hidden_size].set(float(initial_forget_bias))
    bias_s = jnp.zeros((hidden_size,), jnp.float32)
    return w_ih, w_hh, w_sh, bias, bias_s


# -----------------------------------------------------------------------------
# Main
# -----------------------------------------------------------------------------
if __name__ == "__main__":
    # small shapes consistent with the module; B=16 / bb=8 exercises the
    # "parallel" batch axis, T=32 / ts=8 exercises the cross-chunk carry.
    B, T = 16, 32
    input_size_dyn, input_size_stat, hidden_size = 8, 4, 32
    initial_forget_bias = 3

    key = jax.random.PRNGKey(0)
    kx, ks, kp = jax.random.split(key, 3)

    x_d = jax.random.normal(kx, (B, T, input_size_dyn), jnp.float32)
    x_s = jax.random.normal(ks, (B, input_size_stat), jnp.float32)

    w_ih, w_hh, w_sh, bias, bias_s = make_params(
        kp, input_size_dyn, input_size_stat, hidden_size, initial_forget_bias)

    # f32 path: strict correctness vs. reference
    h_n, c_n = ealstm_forward(x_d, x_s, w_ih, w_hh, w_sh, bias, bias_s,
                              ts=8, bb=8)
    h_n = jax.block_until_ready(h_n)
    c_n = jax.block_until_ready(c_n)

    h_ref, c_ref = ealstm_reference(x_d, x_s, w_ih, w_hh, w_sh, bias, bias_s)

    assert h_n.shape == (B, T, hidden_size) and c_n.shape == (B, T, hidden_size)
    assert jnp.allclose(h_n, h_ref, atol=1e-4, rtol=1e-4)
    assert jnp.allclose(c_n, c_ref, atol=1e-4, rtol=1e-4)

    # bf16 matmul-operand path (recommended on v6e/v7x): compile/run sanity.
    h_bf, c_bf = ealstm_forward(x_d, x_s, w_ih, w_hh, w_sh, bias, bias_s,
                                ts=8, bb=8, compute_dtype=jnp.bfloat16)
    h_bf = jax.block_until_ready(h_bf)
    c_bf = jax.block_until_ready(c_bf)
    assert h_bf.shape == (B, T, hidden_size)
    assert bool(jnp.all(jnp.isfinite(h_bf))) and bool(jnp.all(jnp.isfinite(c_bf)))

    print("KERNEL_OK")
</pallas_src>

<mosaic_0001>
module attributes {stable_mosaic.version = 11 : i64} {
  func.func @ealstm_kernel(%arg0: i32, %arg1: i32, %arg2: memref<8x8x96xf32, #tpu.memory_space<vmem>>, %arg3: memref<8x32xf32, #tpu.memory_space<vmem>>, %arg4: memref<32x96xf32, #tpu.memory_space<vmem>>, %arg5: memref<8x8x32xf32, #tpu.memory_space<vmem>>, %arg6: memref<8x8x32xf32, #tpu.memory_space<vmem>>, %arg7: memref<8x32xf32, #tpu.memory_space<vmem>>, %arg8: memref<8x32xf32, #tpu.memory_space<vmem>>) attributes {dimension_semantics = [#tpu.dimension_semantics<parallel>, #tpu.dimension_semantics<arbitrary>], iteration_bounds = array<i64: 2, 4>, scalar_prefetch = 0 : i64, scratch_operands = 2 : i64, tpu.core_type = #tpu.core_type<tc>, window_params = [{transform_indices = @transform_0, window_bounds = array<i64: 8, 8, 96>}, {transform_indices = @transform_1, window_bounds = array<i64: 8, 32>}, {pipeline_mode = #tpu.pipeline_mode<synchronous>, transform_indices = @transform_2, window_bounds = array<i64: 32, 96>}, {transform_indices = @transform_3, window_bounds = array<i64: 8, 8, 32>}, {transform_indices = @transform_4, window_bounds = array<i64: 8, 8, 32>}]} {
    %c0_i32 = arith.constant 0 : i32
    %0 = arith.cmpi eq, %arg1, %c0_i32 : i32
    %1 = arith.extui %0 : i1 to i32
    %c0_i32_0 = arith.constant 0 : i32
    %2 = arith.cmpi ne, %1, %c0_i32_0 : i32
    scf.if %2 {
      %cst_84 = arith.constant 0.000000e+00 : f32
      %265 = vector.broadcast %cst_84 : f32 to vector<8x32xf32>
      %c0_85 = arith.constant 0 : index
      %c0_86 = arith.constant 0 : index
      %266 = vector.load %arg7[%c0_85, %c0_86] : memref<8x32xf32, #tpu.memory_space<vmem>>, vector<8x32xf32>
      tpu.vector_store %arg7[%c0_85, %c0_86], %265 {strides = array<i32>} : memref<8x32xf32, #tpu.memory_space<vmem>>, vector<8x32xf32>,
      %cst_87 = arith.constant 0.000000e+00 : f32
      %267 = vector.broadcast %cst_87 : f32 to vector<8x32xf32>
      %c0_88 = arith.constant 0 : index
      %c0_89 = arith.constant 0 : index
      %268 = vector.load %arg8[%c0_88, %c0_89] : memref<8x32xf32, #tpu.memory_space<vmem>>, vector<8x32xf32>
      tpu.vector_store %arg8[%c0_88, %c0_89], %267 {strides = array<i32>} : memref<8x32xf32, #tpu.memory_space<vmem>>, vector<8x32xf32>,
    } else {
    }
    %c0 = arith.constant 0 : index
    %c0_1 = arith.constant 0 : index
    %3 = vector.load %arg3[%c0, %c0_1] : memref<8x32xf32, #tpu.memory_space<vmem>>, vector<8x32xf32>
    %c0_2 = arith.constant 0 : index
    %c0_3 = arith.constant 0 : index
    %4 = vector.load %arg4[%c0_2, %c0_3] : memref<32x96xf32, #tpu.memory_space<vmem>>, vector<32x96xf32>
    %c0_4 = arith.constant 0 : index
    %c0_5 = arith.constant 0 : index
    %5 = vector.load %arg7[%c0_4, %c0_5] : memref<8x32xf32, #tpu.memory_space<vmem>>, vector<8x32xf32>
    %c0_6 = arith.constant 0 : index
    %c0_7 = arith.constant 0 : index
    %6 = vector.load %arg8[%c0_6, %c0_7] : memref<8x32xf32, #tpu.memory_space<vmem>>, vector<8x32xf32>
    %c0_i32_8 = arith.constant 0 : i32
    %cst = arith.constant dense<0.000000e+00> : vector<8x96xf32>
    %7 = tpu.matmul %5, %4, %cst {dimension_numbers = #tpu.dot_dimension_numbers<[1], [0], [0], [1], [0, 0, 1, 1], [], []>} : vector<8x32xf32>, vector<32x96xf32>, vector<8x96xf32> -> vector<8x96xf32>
    %8 = arith.index_cast %c0_i32_8 : i32 to index
    %c0_9 = arith.constant 0 : index
    %c0_10 = arith.constant 0 : index
    %9 = vector.load %arg2[%8, %c0_9, %c0_10] : memref<8x8x96xf32, #tpu.memory_space<vmem>>, vector<1x8x96xf32>
    %10 = vector.shape_cast %9 : vector<1x8x96xf32> to vector<8x96xf32>
    %11 = arith.addf %7, %10 : vector<8x96xf32>
    %12 = vector.extract_strided_slice %11 {offsets = [0, 0], sizes = [8, 32], strides = [1, 1]} : vector<8x96xf32> to vector<8x32xf32>
    %13 = vector.extract_strided_slice %11 {offsets = [0, 32], sizes = [8, 32], strides = [1, 1]} : vector<8x96xf32> to vector<8x32xf32>
    %14 = vector.extract_strided_slice %11 {offsets = [0, 64], sizes = [8, 32], strides = [1, 1]} : vector<8x96xf32> to vector<8x32xf32>
    %15 = arith.negf %12 : vector<8x32xf32>
    %16 = math.exp %15 : vector<8x32xf32>
    %cst_11 = arith.constant 1.000000e+00 : f32
    %17 = vector.broadcast %cst_11 : f32 to vector<8x32xf32>
    %18 = arith.addf %17, %16 : vector<8x32xf32>
    %19 = arith.divf %17, %18 : vector<8x32xf32>
    %20 = arith.mulf %19, %6 : vector<8x32xf32>
    %21 = math.tanh %14 : vector<8x32xf32>
    %22 = arith.mulf %3, %21 : vector<8x32xf32>
    %23 = arith.addf %20, %22 : vector<8x32xf32>
    %24 = arith.negf %13 : vector<8x32xf32>
    %25 = math.exp %24 : vector<8x32xf32>
    %cst_12 = arith.constant 1.000000e+00 : f32
    %26 = vector.broadcast %cst_12 : f32 to vector<8x32xf32>
    %27 = arith.addf %26, %25 : vector<8x32xf32>
    %28 = arith.divf %26, %27 : vector<8x32xf32>
    %29 = math.tanh %23 : vector<8x32xf32>
    %30 = arith.mulf %28, %29 : vector<8x32xf32>
    %31 = arith.index_cast %c0_i32_8 : i32 to index
    %c0_13 = arith.constant 0 : index
    %c0_14 = arith.constant 0 : index
    %32 = vector.load %arg5[%31, %c0_13, %c0_14] : memref<8x8x32xf32, #tpu.memory_space<vmem>>, vector<1x8x32xf32>
    %33 = vector.shape_cast %32 : vector<1x8x32xf32> to vector<8x32xf32>
    %34 = vector.shape_cast %30 : vector<8x32xf32> to vector<1x8x32xf32>
    tpu.vector_store %arg5[%31, %c0_13, %c0_14], %34 {strides = array<i32>} : memref<8x8x32xf32, #tpu.memory_space<vmem>>, vector<1x8x32xf32>,
    %35 = arith.index_cast %c0_i32_8 : i32 to index
    %c0_15 = arith.constant 0 : index
    %c0_16 = arith.constant 0 : index
    %36 = vector.load %arg6[%35, %c0_15, %c0_16] : memref<8x8x32xf32, #tpu.memory_space<vmem>>, vector<1x8x32xf32>
    %37 = vector.shape_cast %36 : vector<1x8x32xf32> to vector<8x32xf32>
    %38 = vector.shape_cast %23 : vector<8x32xf32> to vector<1x8x32xf32>
    tpu.vector_store %arg6[%35, %c0_15, %c0_16], %38 {strides = array<i32>} : memref<8x8x32xf32, #tpu.memory_space<vmem>>, vector<1x8x32xf32>,
    %c1_i32 = arith.constant 1 : i32
    %cst_17 = arith.constant dense<0.000000e+00> : vector<8x96xf32>
    %39 = tpu.matmul %30, %4, %cst_17 {dimension_numbers = #tpu.dot_dimension_numbers<[1], [0], [0], [1], [0, 0, 1, 1], [], []>} : vector<8x32xf32>, vector<32x96xf32>, vector<8x96xf32> -> vector<8x96xf32>
    %40 = arith.index_cast %c1_i32 : i32 to index
    %c0_18 = arith.constant 0 : index
    %c0_19 = arith.constant 0 : index
    %41 = vector.load %arg2[%40, %c0_18, %c0_19] : memref<8x8x96xf32, #tpu.memory_space<vmem>>, vector<1x8x96xf32>
    %42 = vector.shape_cast %41 : vector<1x8x96xf32> to vector<8x96xf32>
    %43 = arith.addf %39, %42 : vector<8x96xf32>
    %44 = vector.extract_strided_slice %43 {offsets = [0, 0], sizes = [8, 32], strides = [1, 1]} : vector<8x96xf32> to vector<8x32xf32>
    %45 = vector.extract_strided_slice %43 {offsets = [0, 32], sizes = [8, 32], strides = [1, 1]} : vector<8x96xf32> to vector<8x32xf32>
    %46 = vector.extract_strided_slice %43 {offsets = [0, 64], sizes = [8, 32], strides = [1, 1]} : vector<8x96xf32> to vector<8x32xf32>
    %47 = arith.negf %44 : vector<8x32xf32>
    %48 = math.exp %47 : vector<8x32xf32>
    %cst_20 = arith.constant 1.000000e+00 : f32
    %49 = vector.broadcast %cst_20 : f32 to vector<8x32xf32>
    %50 = arith.addf %49, %48 : vector<8x32xf32>
    %51 = arith.divf %49, %50 : vector<8x32xf32>
    %52 = arith.mulf %51, %23 : vector<8x32xf32>
    %53 = math.tanh %46 : vector<8x32xf32>
    %54 = arith.mulf %3, %53 : vector<8x32xf32>
    %55 = arith.addf %52, %54 : vector<8x32xf32>
    %56 = arith.negf %45 : vector<8x32xf32>
    %57 = math.exp %56 : vector<8x32xf32>
    %cst_21 = arith.constant 1.000000e+00 : f32
    %58 = vector.broadcast %cst_21 : f32 to vector<8x32xf32>
    %59 = arith.addf %58, %57 : vector<8x32xf32>
    %60 = arith.divf %58, %59 : vector<8x32xf32>
    %61 = math.tanh %55 : vector<8x32xf32>
    %62 = arith.mulf %60, %61 : vector<8x32xf32>
    %63 = arith.index_cast %c1_i32 : i32 to index
    %c0_22 = arith.constant 0 : index
    %c0_23 = arith.constant 0 : index
    %64 = vector.load %arg5[%63, %c0_22, %c0_23] : memref<8x8x32xf32, #tpu.memory_space<vmem>>, vector<1x8x32xf32>
    %65 = vector.shape_cast %64 : vector<1x8x32xf32> to vector<8x32xf32>
    %66 = vector.shape_cast %62 : vector<8x32xf32> to vector<1x8x32xf32>
    tpu.vector_store %arg5[%63, %c0_22, %c0_23], %66 {strides = array<i32>} : memref<8x8x32xf32, #tpu.memory_space<vmem>>, vector<1x8x32xf32>,
    %67 = arith.index_cast %c1_i32 : i32 to index
    %c0_24 = arith.constant 0 : index
    %c0_25 = arith.constant 0 : index
    %68 = vector.load %arg6[%67, %c0_24, %c0_25] : memref<8x8x32xf32, #tpu.memory_space<vmem>>, vector<1x8x32xf32>
    %69 = vector.shape_cast %68 : vector<1x8x32xf32> to vector<8x32xf32>
    %70 = vector.shape_cast %55 : vector<8x32xf32> to vector<1x8x32xf32>
    tpu.vector_store %arg6[%67, %c0_24, %c0_25], %70 {strides = array<i32>} : memref<8x8x32xf32, #tpu.memory_space<vmem>>, vector<1x8x32xf32>,
    %c2_i32 = arith.constant 2 : i32
    %cst_26 = arith.constant dense<0.000000e+00> : vector<8x96xf32>
    %71 = tpu.matmul %62, %4, %cst_26 {dimension_numbers = #tpu.dot_dimension_numbers<[1], [0], [0], [1], [0, 0, 1, 1], [], []>} : vector<8x32xf32>, vector<32x96xf32>, vector<8x96xf32> -> vector<8x96xf32>
    %72 = arith.index_cast %c2_i32 : i32 to index
    %c0_27 = arith.constant 0 : index
    %c0_28 = arith.constant 0 : index
    %73 = vector.load %arg2[%72, %c0_27, %c0_28] : memref<8x8x96xf32, #tpu.memory_space<vmem>>, vector<1x8x96xf32>
    %74 = vector.shape_cast %73 : vector<1x8x96xf32> to vector<8x96xf32>
    %75 = arith.addf %71, %74 : vector<8x96xf32>
    %76 = vector.extract_strided_slice %75 {offsets = [0, 0], sizes = [8, 32], strides = [1, 1]} : vector<8x96xf32> to vector<8x32xf32>
    %77 = vector.extract_strided_slice %75 {offsets = [0, 32], sizes = [8, 32], strides = [1, 1]} : vector<8x96xf32> to vector<8x32xf32>
    %78 = vector.extract_strided_slice %75 {offsets = [0, 64], sizes = [8, 32], strides = [1, 1]} : vector<8x96xf32> to vector<8x32xf32>
    %79 = arith.negf %76 : vector<8x32xf32>
    %80 = math.exp %79 : vector<8x32xf32>
    %cst_29 = arith.constant 1.000000e+00 : f32
    %81 = vector.broadcast %cst_29 : f32 to vector<8x32xf32>
    %82 = arith.addf %81, %80 : vector<8x32xf32>
    %83 = arith.divf %81, %82 : vector<8x32xf32>
    %84 = arith.mulf %83, %55 : vector<8x32xf32>
    %85 = math.tanh %78 : vector<8x32xf32>
    %86 = arith.mulf %3, %85 : vector<8x32xf32>
    %87 = arith.addf %84, %86 : vector<8x32xf32>
    %88 = arith.negf %77 : vector<8x32xf32>
    %89 = math.exp %88 : vector<8x32xf32>
    %cst_30 = arith.constant 1.000000e+00 : f32
    %90 = vector.broadcast %cst_30 : f32 to vector<8x32xf32>
    %91 = arith.addf %90, %89 : vector<8x32xf32>
    %92 = arith.divf %90, %91 : vector<8x32xf32>
    %93 = math.tanh %87 : vector<8x32xf32>
    %94 = arith.mulf %92, %93 : vector<8x32xf32>
    %95 = arith.index_cast %c2_i32 : i32 to index
    %c0_31 = arith.constant 0 : index
    %c0_32 = arith.constant 0 : index
    %96 = vector.load %arg5[%95, %c0_31, %c0_32] : memref<8x8x32xf32, #tpu.memory_space<vmem>>, vector<1x8x32xf32>
    %97 = vector.shape_cast %96 : vector<1x8x32xf32> to vector<8x32xf32>
    %98 = vector.shape_cast %94 : vector<8x32xf32> to vector<1x8x32xf32>
    tpu.vector_store %arg5[%95, %c0_31, %c0_32], %98 {strides = array<i32>} : memref<8x8x32xf32, #tpu.memory_space<vmem>>, vector<1x8x32xf32>,
    %99 = arith.index_cast %c2_i32 : i32 to index
    %c0_33 = arith.constant 0 : index
    %c0_34 = arith.constant 0 : index
    %100 = vector.load %arg6[%99, %c0_33, %c0_34] : memref<8x8x32xf32, #tpu.memory_space<vmem>>, vector<1x8x32xf32>
    %101 = vector.shape_cast %100 : vector<1x8x32xf32> to vector<8x32xf32>
    %102 = vector.shape_cast %87 : vector<8x32xf32> to vector<1x8x32xf32>
    tpu.vector_store %arg6[%99, %c0_33, %c0_34], %102 {strides = array<i32>} : memref<8x8x32xf32, #tpu.memory_space<vmem>>, vector<1x8x32xf32>,
    %c3_i32 = arith.constant 3 : i32
    %cst_35 = arith.constant dense<0.000000e+00> : vector<8x96xf32>
    %103 = tpu.matmul %94, %4, %cst_35 {dimension_numbers = #tpu.dot_dimension_numbers<[1], [0], [0], [1], [0, 0, 1, 1], [], []>} : vector<8x32xf32>, vector<32x96xf32>, vector<8x96xf32> -> vector<8x96xf32>
    %104 = arith.index_cast %c3_i32 : i32 to index
    %c0_36 = arith.constant 0 : index
    %c0_37 = arith.constant 0 : index
    %105 = vector.load %arg2[%104, %c0_36, %c0_37] : memref<8x8x96xf32, #tpu.memory_space<vmem>>, vector<1x8x96xf32>
    %106 = vector.shape_cast %105 : vector<1x8x96xf32> to vector<8x96xf32>
    %107 = arith.addf %103, %106 : vector<8x96xf32>
    %108 = vector.extract_strided_slice %107 {offsets = [0, 0], sizes = [8, 32], strides = [1, 1]} : vector<8x96xf32> to vector<8x32xf32>
    %109 = vector.extract_strided_slice %107 {offsets = [0, 32], sizes = [8, 32], strides = [1, 1]} : vector<8x96xf32> to vector<8x32xf32>
    %110 = vector.extract_strided_slice %107 {offsets = [0, 64], sizes = [8, 32], strides = [1, 1]} : vector<8x96xf32> to vector<8x32xf32>
    %111 = arith.negf %108 : vector<8x32xf32>
    %112 = math.exp %111 : vector<8x32xf32>
    %cst_38 = arith.constant 1.000000e+00 : f32
    %113 = vector.broadcast %cst_38 : f32 to vector<8x32xf32>
    %114 = arith.addf %113, %112 : vector<8x32xf32>
    %115 = arith.divf %113, %114 : vector<8x32xf32>
    %116 = arith.mulf %115, %87 : vector<8x32xf32>
    %117 = math.tanh %110 : vector<8x32xf32>
    %118 = arith.mulf %3, %117 : vector<8x32xf32>
    %119 = arith.addf %116, %118 : vector<8x32xf32>
    %120 = arith.negf %109 : vector<8x32xf32>
    %121 = math.exp %120 : vector<8x32xf32>
    %cst_39 = arith.constant 1.000000e+00 : f32
    %122 = vector.broadcast %cst_39 : f32 to vector<8x32xf32>
    %123 = arith.addf %122, %121 : vector<8x32xf32>
    %124 = arith.divf %122, %123 : vector<8x32xf32>
    %125 = math.tanh %119 : vector<8x32xf32>
    %126 = arith.mulf %124, %125 : vector<8x32xf32>
    %127 = arith.index_cast %c3_i32 : i32 to index
    %c0_40 = arith.constant 0 : index
    %c0_41 = arith.constant 0 : index
    %128 = vector.load %arg5[%127, %c0_40, %c0_41] : memref<8x8x32xf32, #tpu.memory_space<vmem>>, vector<1x8x32xf32>
    %129 = vector.shape_cast %128 : vector<1x8x32xf32> to vector<8x32xf32>
    %130 = vector.shape_cast %126 : vector<8x32xf32> to vector<1x8x32xf32>
    tpu.vector_store %arg5[%127, %c0_40, %c0_41], %130 {strides = array<i32>} : memref<8x8x32xf32, #tpu.memory_space<vmem>>, vector<1x8x32xf32>,
    %131 = arith.index_cast %c3_i32 : i32 to index
    %c0_42 = arith.constant 0 : index
    %c0_43 = arith.constant 0 : index
    %132 = vector.load %arg6[%131, %c0_42, %c0_43] : memref<8x8x32xf32, #tpu.memory_space<vmem>>, vector<1x8x32xf32>
    %133 = vector.shape_cast %132 : vector<1x8x32xf32> to vector<8x32xf32>
    %134 = vector.shape_cast %119 : vector<8x32xf32> to vector<1x8x32xf32>
    tpu.vector_store %arg6[%131, %c0_42, %c0_43], %134 {strides = array<i32>} : memref<8x8x32xf32, #tpu.memory_space<vmem>>, vector<1x8x32xf32>,
    %c4_i32 = arith.constant 4 : i32
    %cst_44 = arith.constant dense<0.000000e+00> : vector<8x96xf32>
    %135 = tpu.matmul %126, %4, %cst_44 {dimension_numbers = #tpu.dot_dimension_numbers<[1], [0], [0], [1], [0, 0, 1, 1], [], []>} : vector<8x32xf32>, vector<32x96xf32>, vector<8x96xf32> -> vector<8x96xf32>
    %136 = arith.index_cast %c4_i32 : i32 to index
    %c0_45 = arith.constant 0 : index
    %c0_46 = arith.constant 0 : index
    %137 = vector.load %arg2[%136, %c0_45, %c0_46] : memref<8x8x96xf32, #tpu.memory_space<vmem>>, vector<1x8x96xf32>
    %138 = vector.shape_cast %137 : vector<1x8x96xf32> to vector<8x96xf32>
    %139 = arith.addf %135, %138 : vector<8x96xf32>
    %140 = vector.extract_strided_slice %139 {offsets = [0, 0], sizes = [8, 32], strides = [1, 1]} : vector<8x96xf32> to vector<8x32xf32>
    %141 = vector.extract_strided_slice %139 {offsets = [0, 32], sizes = [8, 32], strides = [1, 1]} : vector<8x96xf32> to vector<8x32xf32>
    %142 = vector.extract_strided_slice %139 {offsets = [0, 64], sizes = [8, 32], strides = [1, 1]} : vector<8x96xf32> to vector<8x32xf32>
    %143 = arith.negf %140 : vector<8x32xf32>
    %144 = math.exp %143 : vector<8x32xf32>
    %cst_47 = arith.constant 1.000000e+00 : f32
    %145 = vector.broadcast %cst_47 : f32 to vector<8x32xf32>
    %146 = arith.addf %145, %144 : vector<8x32xf32>
    %147 = arith.divf %145, %146 : vector<8x32xf32>
    %148 = arith.mulf %147, %119 : vector<8x32xf32>
    %149 = math.tanh %142 : vector<8x32xf32>
    %150 = arith.mulf %3, %149 : vector<8x32xf32>
    %151 = arith.addf %148, %150 : vector<8x32xf32>
    %152 = arith.negf %141 : vector<8x32xf32>
    %153 = math.exp %152 : vector<8x32xf32>
    %cst_48 = arith.constant 1.000000e+00 : f32
    %154 = vector.broadcast %cst_48 : f32 to vector<8x32xf32>
    %155 = arith.addf %154, %153 : vector<8x32xf32>
    %156 = arith.divf %154, %155 : vector<8x32xf32>
    %157 = math.tanh %151 : vector<8x32xf32>
    %158 = arith.mulf %156, %157 : vector<8x32xf32>
    %159 = arith.index_cast %c4_i32 : i32 to index
    %c0_49 = arith.constant 0 : index
    %c0_50 = arith.constant 0 : index
    %160 = vector.load %arg5[%159, %c0_49, %c0_50] : memref<8x8x32xf32, #tpu.memory_space<vmem>>, vector<1x8x32xf32>
    %161 = vector.shape_cast %160 : vector<1x8x32xf32> to vector<8x32xf32>
    %162 = vector.shape_cast %158 : vector<8x32xf32> to vector<1x8x32xf32>
    tpu.vector_store %arg5[%159, %c0_49, %c0_50], %162 {strides = array<i32>} : memref<8x8x32xf32, #tpu.memory_space<vmem>>, vector<1x8x32xf32>,
    %163 = arith.index_cast %c4_i32 : i32 to index
    %c0_51 = arith.constant 0 : index
    %c0_52 = arith.constant 0 : index
    %164 = vector.load %arg6[%163, %c0_51, %c0_52] : memref<8x8x32xf32, #tpu.memory_space<vmem>>, vector<1x8x32xf32>
    %165 = vector.shape_cast %164 : vector<1x8x32xf32> to vector<8x32xf32>
    %166 = vector.shape_cast %151 : vector<8x32xf32> to vector<1x8x32xf32>
    tpu.vector_store %arg6[%163, %c0_51, %c0_52], %166 {strides = array<i32>} : memref<8x8x32xf32, #tpu.memory_space<vmem>>, vector<1x8x32xf32>,
    %c5_i32 = arith.constant 5 : i32
    %cst_53 = arith.constant dense<0.000000e+00> : vector<8x96xf32>
    %167 = tpu.matmul %158, %4, %cst_53 {dimension_numbers = #tpu.dot_dimension_numbers<[1], [0], [0], [1], [0, 0, 1, 1], [], []>} : vector<8x32xf32>, vector<32x96xf32>, vector<8x96xf32> -> vector<8x96xf32>
    %168 = arith.index_cast %c5_i32 : i32 to index
    %c0_54 = arith.constant 0 : index
    %c0_55 = arith.constant 0 : index
    %169 = vector.load %arg2[%168, %c0_54, %c0_55] : memref<8x8x96xf32, #tpu.memory_space<vmem>>, vector<1x8x96xf32>
    %170 = vector.shape_cast %169 : vector<1x8x96xf32> to vector<8x96xf32>
    %171 = arith.addf %167, %170 : vector<8x96xf32>
    %172 = vector.extract_strided_slice %171 {offsets = [0, 0], sizes = [8, 32], strides = [1, 1]} : vector<8x96xf32> to vector<8x32xf32>
    %173 = vector.extract_strided_slice %171 {offsets = [0, 32], sizes = [8, 32], strides = [1, 1]} : vector<8x96xf32> to vector<8x32xf32>
    %174 = vector.extract_strided_slice %171 {offsets = [0, 64], sizes = [8, 32], strides = [1, 1]} : vector<8x96xf32> to vector<8x32xf32>
    %175 = arith.negf %172 : vector<8x32xf32>
    %176 = math.exp %175 : vector<8x32xf32>
    %cst_56 = arith.constant 1.000000e+00 : f32
    %177 = vector.broadcast %cst_56 : f32 to vector<8x32xf32>
    %178 = arith.addf %177, %176 : vector<8x32xf32>
    %179 = arith.divf %177, %178 : vector<8x32xf32>
    %180 = arith.mulf %179, %151 : vector<8x32xf32>
    %181 = math.tanh %174 : vector<8x32xf32>
    %182 = arith.mulf %3, %181 : vector<8x32xf32>
    %183 = arith.addf %180, %182 : vector<8x32xf32>
    %184 = arith.negf %173 : vector<8x32xf32>
    %185 = math.exp %184 : vector<8x32xf32>
    %cst_57 = arith.constant 1.000000e+00 : f32
    %186 = vector.broadcast %cst_57 : f32 to vector<8x32xf32>
    %187 = arith.addf %186, %185 : vector<8x32xf32>
    %188 = arith.divf %186, %187 : vector<8x32xf32>
    %189 = math.tanh %183 : vector<8x32xf32>
    %190 = arith.mulf %188, %189 : vector<8x32xf32>
    %191 = arith.index_cast %c5_i32 : i32 to index
    %c0_58 = arith.constant 0 : index
    %c0_59 = arith.constant 0 : index
    %192 = vector.load %arg5[%191, %c0_58, %c0_59] : memref<8x8x32xf32, #tpu.memory_space<vmem>>, vector<1x8x32xf32>
    %193 = vector.shape_cast %192 : vector<1x8x32xf32> to vector<8x32xf32>
    %194 = vector.shape_cast %190 : vector<8x32xf32> to vector<1x8x32xf32>
    tpu.vector_store %arg5[%191, %c0_58, %c0_59], %194 {strides = array<i32>} : memref<8x8x32xf32, #tpu.memory_space<vmem>>, vector<1x8x32xf32>,
    %195 = arith.index_cast %c5_i32 : i32 to index
    %c0_60 = arith.constant 0 : index
    %c0_61 = arith.constant 0 : index
    %196 = vector.load %arg6[%195, %c0_60, %c0_61] : memref<8x8x32xf32, #tpu.memory_space<vmem>>, vector<1x8x32xf32>
    %197 = vector.shape_cast %196 : vector<1x8x32xf32> to vector<8x32xf32>
    %198 = vector.shape_cast %183 : vector<8x32xf32> to vector<1x8x32xf32>
    tpu.vector_store %arg6[%195, %c0_60, %c0_61], %198 {strides = array<i32>} : memref<8x8x32xf32, #tpu.memory_space<vmem>>, vector<1x8x32xf32>,
    %c6_i32 = arith.constant 6 : i32
    %cst_62 = arith.constant dense<0.000000e+00> : vector<8x96xf32>
    %199 = tpu.matmul %190, %4, %cst_62 {dimension_numbers = #tpu.dot_dimension_numbers<[1], [0], [0], [1], [0, 0, 1, 1], [], []>} : vector<8x32xf32>, vector<32x96xf32>, vector<8x96xf32> -> vector<8x96xf32>
    %200 = arith.index_cast %c6_i32 : i32 to index
    %c0_63 = arith.constant 0 : index
    %c0_64 = arith.constant 0 : index
    %201 = vector.load %arg2[%200, %c0_63, %c0_64] : memref<8x8x96xf32, #tpu.memory_space<vmem>>, vector<1x8x96xf32>
    %202 = vector.shape_cast %201 : vector<1x8x96xf32> to vector<8x96xf32>
    %203 = arith.addf %199, %202 : vector<8x96xf32>
    %204 = vector.extract_strided_slice %203 {offsets = [0, 0], sizes = [8, 32], strides = [1, 1]} : vector<8x96xf32> to vector<8x32xf32>
    %205 = vector.extract_strided_slice %203 {offsets = [0, 32], sizes = [8, 32], strides = [1, 1]} : vector<8x96xf32> to vector<8x32xf32>
    %206 = vector.extract_strided_slice %203 {offsets = [0, 64], sizes = [8, 32], strides = [1, 1]} : vector<8x96xf32> to vector<8x32xf32>
    %207 = arith.negf %204 : vector<8x32xf32>
    %208 = math.exp %207 : vector<8x32xf32>
    %cst_65 = arith.constant 1.000000e+00 : f32
    %209 = vector.broadcast %cst_65 : f32 to vector<8x32xf32>
    %210 = arith.addf %209, %208 : vector<8x32xf32>
    %211 = arith.divf %209, %210 : vector<8x32xf32>
    %212 = arith.mulf %211, %183 : vector<8x32xf32>
    %213 = math.tanh %206 : vector<8x32xf32>
    %214 = arith.mulf %3, %213 : vector<8x32xf32>
    %215 = arith.addf %212, %214 : vector<8x32xf32>
    %216 = arith.negf %205 : vector<8x32xf32>
    %217 = math.exp %216 : vector<8x32xf32>
    %cst_66 = arith.constant 1.000000e+00 : f32
    %218 = vector.broadcast %cst_66 : f32 to vector<8x32xf32>
    %219 = arith.addf %218, %217 : vector<8x32xf32>
    %220 = arith.divf %218, %219 : vector<8x32xf32>
    %221 = math.tanh %215 : vector<8x32xf32>
    %222 = arith.mulf %220, %221 : vector<8x32xf32>
    %223 = arith.index_cast %c6_i32 : i32 to index
    %c0_67 = arith.constant 0 : index
    %c0_68 = arith.constant 0 : index
    %224 = vector.load %arg5[%223, %c0_67, %c0_68] : memref<8x8x32xf32, #tpu.memory_space<vmem>>, vector<1x8x32xf32>
    %225 = vector.shape_cast %224 : vector<1x8x32xf32> to vector<8x32xf32>
    %226 = vector.shape_cast %222 : vector<8x32xf32> to vector<1x8x32xf32>
    tpu.vector_store %arg5[%223, %c0_67, %c0_68], %226 {strides = array<i32>} : memref<8x8x32xf32, #tpu.memory_space<vmem>>, vector<1x8x32xf32>,
    %227 = arith.index_cast %c6_i32 : i32 to index
    %c0_69 = arith.constant 0 : index
    %c0_70 = arith.constant 0 : index
    %228 = vector.load %arg6[%227, %c0_69, %c0_70] : memref<8x8x32xf32, #tpu.memory_space<vmem>>, vector<1x8x32xf32>
    %229 = vector.shape_cast %228 : vector<1x8x32xf32> to vector<8x32xf32>
    %230 = vector.shape_cast %215 : vector<8x32xf32> to vector<1x8x32xf32>
    tpu.vector_store %arg6[%227, %c0_69, %c0_70], %230 {strides = array<i32>} : memref<8x8x32xf32, #tpu.memory_space<vmem>>, vector<1x8x32xf32>,
    %c7_i32 = arith.constant 7 : i32
    %cst_71 = arith.constant dense<0.000000e+00> : vector<8x96xf32>
    %231 = tpu.matmul %222, %4, %cst_71 {dimension_numbers = #tpu.dot_dimension_numbers<[1], [0], [0], [1], [0, 0, 1, 1], [], []>} : vector<8x32xf32>, vector<32x96xf32>, vector<8x96xf32> -> vector<8x96xf32>
    %232 = arith.index_cast %c7_i32 : i32 to index
    %c0_72 = arith.constant 0 : index
    %c0_73 = arith.constant 0 : index
    %233 = vector.load %arg2[%232, %c0_72, %c0_73] : memref<8x8x96xf32, #tpu.memory_space<vmem>>, vector<1x8x96xf32>
    %234 = vector.shape_cast %233 : vector<1x8x96xf32> to vector<8x96xf32>
    %235 = arith.addf %231, %234 : vector<8x96xf32>
    %236 = vector.extract_strided_slice %235 {offsets = [0, 0], sizes = [8, 32], strides = [1, 1]} : vector<8x96xf32> to vector<8x32xf32>
    %237 = vector.extract_strided_slice %235 {offsets = [0, 32], sizes = [8, 32], strides = [1, 1]} : vector<8x96xf32> to vector<8x32xf32>
    %238 = vector.extract_strided_slice %235 {offsets = [0, 64], sizes = [8, 32], strides = [1, 1]} : vector<8x96xf32> to vector<8x32xf32>
    %239 = arith.negf %236 : vector<8x32xf32>
    %240 = math.exp %239 : vector<8x32xf32>
    %cst_74 = arith.constant 1.000000e+00 : f32
    %241 = vector.broadcast %cst_74 : f32 to vector<8x32xf32>
    %242 = arith.addf %241, %240 : vector<8x32xf32>
    %243 = arith.divf %241, %242 : vector<8x32xf32>
    %244 = arith.mulf %243, %215 : vector<8x32xf32>
    %245 = math.tanh %238 : vector<8x32xf32>
    %246 = arith.mulf %3, %245 : vector<8x32xf32>
    %247 = arith.addf %244, %246 : vector<8x32xf32>
    %248 = arith.negf %237 : vector<8x32xf32>
    %249 = math.exp %248 : vector<8x32xf32>
    %cst_75 = arith.constant 1.000000e+00 : f32
    %250 = vector.broadcast %cst_75 : f32 to vector<8x32xf32>
    %251 = arith.addf %250, %249 : vector<8x32xf32>
    %252 = arith.divf %250, %251 : vector<8x32xf32>
    %253 = math.tanh %247 : vector<8x32xf32>
    %254 = arith.mulf %252, %253 : vector<8x32xf32>
    %255 = arith.index_cast %c7_i32 : i32 to index
    %c0_76 = arith.constant 0 : index
    %c0_77 = arith.constant 0 : index
    %256 = vector.load %arg5[%255, %c0_76, %c0_77] : memref<8x8x32xf32, #tpu.memory_space<vmem>>, vector<1x8x32xf32>
    %257 = vector.shape_cast %256 : vector<1x8x32xf32> to vector<8x32xf32>
    %258 = vector.shape_cast %254 : vector<8x32xf32> to vector<1x8x32xf32>
    tpu.vector_store %arg5[%255, %c0_76, %c0_77], %258 {strides = array<i32>} : memref<8x8x32xf32, #tpu.memory_space<vmem>>, vector<1x8x32xf32>,
    %259 = arith.index_cast %c7_i32 : i32 to index
    %c0_78 = arith.constant 0 : index
    %c0_79 = arith.constant 0 : index
    %260 = vector.load %arg6[%259, %c0_78, %c0_79] : memref<8x8x32xf32, #tpu.memory_space<vmem>>, vector<1x8x32xf32>
    %261 = vector.shape_cast %260 : vector<1x8x32xf32> to vector<8x32xf32>
    %262 = vector.shape_cast %247 : vector<8x32xf32> to vector<1x8x32xf32>
    tpu.vector_store %arg6[%259, %c0_78, %c0_79], %262 {strides = array<i32>} : memref<8x8x32xf32, #tpu.memory_space<vmem>>, vector<1x8x32xf32>,
    %c8_i32 = arith.constant 8 : i32
    %c0_80 = arith.constant 0 : index
    %c0_81 = arith.constant 0 : index
    %263 = vector.load %arg7[%c0_80, %c0_81] : memref<8x32xf32, #tpu.memory_space<vmem>>, vector<8x32xf32>
    tpu.vector_store %arg7[%c0_80, %c0_81], %254 {strides = array<i32>} : memref<8x32xf32, #tpu.memory_space<vmem>>, vector<8x32xf32>,
    %c0_82 = arith.constant 0 : index
    %c0_83 = arith.constant 0 : index
    %264 = vector.load %arg8[%c0_82, %c0_83] : memref<8x32xf32, #tpu.memory_space<vmem>>, vector<8x32xf32>
    tpu.vector_store %arg8[%c0_82, %c0_83], %247 {strides = array<i32>} : memref<8x32xf32, #tpu.memory_space<vmem>>, vector<8x32xf32>,
    return
  }
  func.func @transform_0(%arg0: i32, %arg1: i32) -> (i32, i32, i32) {
    %c0_i32 = arith.constant 0 : i32
    %c0_i32_0 = arith.constant 0 : i32
    return %arg1, %arg0, %c0_i32 : i32, i32, i32
  }
  func.func @transform_1(%arg0: i32, %arg1: i32) -> (i32, i32) {
    %c0_i32 = arith.constant 0 : i32
    %c0_i32_0 = arith.constant 0 : i32
    return %arg0, %c0_i32 : i32, i32
  }
  func.func @transform_2(%arg0: i32, %arg1: i32) -> (i32, i32) {
    %c0_i32 = arith.constant 0 : i32
    %c0_i32_0 = arith.constant 0 : i32
    %c0_i32_1 = arith.constant 0 : i32
    return %c0_i32, %c0_i32_0 : i32, i32
  }
  func.func @transform_3(%arg0: i32, %arg1: i32) -> (i32, i32, i32) {
    %c0_i32 = arith.constant 0 : i32
    %c0_i32_0 = arith.constant 0 : i32
    return %arg1, %arg0, %c0_i32 : i32, i32, i32
  }
  func.func @transform_4(%arg0: i32, %arg1: i32) -> (i32, i32, i32) {
    %c0_i32 = arith.constant 0 : i32
    %c0_i32_0 = arith.constant 0 : i32
    return %arg1, %arg0, %c0_i32 : i32, i32, i32
  }
}

</mosaic_0001>

<bundles_post_ra>
// kernel: ealstm_forward.1
= control target key start
LH: loop header
LB: loop body
LE: loop exit
PB: predicated region body
PF: predicated region fallthrough
CT: control target
= control target key end

     0   :  { %s1799_s15 = smov 0   ;;  %s1801_s16 = smov 0   ;;  %s2117_s0 = inlined_call_operand.vmem [shape: f32[32,16,96], index: 0, kind: input, shape index: {}]   ;;  %s2118_s1 = inlined_call_operand.vmem [shape: f32[16,32], index: 1, kind: input, shape index: {}]   ;;  %s2119_s2 = inlined_call_operand.vmem [shape: f32[32,96], index: 2, kind: input, shape index: {}]   ;;  %s2120_s3 = inlined_call_operand.vmem [shape: f32[32,16,32], index: 3, kind: output, shape index: {0}]   ;;  %s2121_s4 = inlined_call_operand.vmem [shape: f32[32,16,32], index: 4, kind: output, shape index: {1}]  }
   0x1   :  { %s1803_s17 = smov 0   ;;  %s1805_s18 = smov 0  }
   0x2   :  { %s1807_s19 = smov 0   ;;  %s1809_s20 = smov 0  }
   0x3   :  { %s1811_s21 = smov 0  }
   0x4 LB: > { %s24_s22 = sadd.s32 1, %s1758_s19  ;;  %s27_s23 = sadd.s32 1, %s1762_s20  ;;  %s1766_s21 = sphi %s1811_s21, %s15_s21   ;;  %s1762_s20 = sphi %s1809_s20, %s2128_s20   ;;  %s1758_s19 = sphi %s1807_s19, %s2127_s19   ;;  %s1754_s18 = sphi %s1805_s18, %s2126_s18   ;;  %s1750_s17 = sphi %s1803_s17, %s2125_s17   ;;  %s1746_s16 = sphi %s1801_s16, %s2124_s16   ;;  %s1742_s15 = sphi %s1799_s15, %s2123_s15  }
   0x5   : > { %p25_p0 = scmp.ge.s32.totalorder %s24_s22, 4  ;;  %s1394_s24 = sadd.s32 4294967295, %s1766_s21  }
   0x6   : > { %p43_p1 = scmp.ne.s32.totalorder %s1746_s16, %s1742_s15  ;;  %p44_p2 = scmp.eq.s32.totalorder %s1766_s21, 0 }
   0x7   : > { %s2130_s22 = smov (%p25_p0, %s24_s22), 0  ;;  %s2132_s23 = smov (!%p25_p0, %s27_s23), %s1762_s20 }
   0x8   : > { %p29_p3 = scmp.ge.s32.totalorder %s2132_s23, 2  ;;  %p122_p4 = scmp.eq.s32.totalorder %s1394_s24, 7 }
   0x9   : > { %s31_s25 = ssub.s32 %s1758_s19, %s2130_s22  ;;  %p45_p5 = por %p44_p2, %p43_p1 }
   0xa   : > { %s2134_s23 = smov (%p29_p3, %s2132_s23), 0  ;;  %p1847_p6 = por %p122_p4, %p43_p1 }
   0xb   : > { %s32_s27 = ssub.s32 %s1762_s20, %s2134_s23  ;;  %s36_s29 = sadd.s32 1, %s1746_s16 }
   0xc   : > { %s33_s28 = sor.u32 %s32_s27, %s31_s25  ;;  %p1397_p8 = scmp.ge.s32.totalorder %s1766_s21, 8 }
   0xd   : > { %p34_p7 = scmp.eq.s32.totalorder %s33_s28, 0 }
   0xe   : > { %175 = sbr.rel (%p1397_p8) target bundleno = 29 (0x1d), region = 20 }
   0xf   : > { %s1855_s30 = scalar_select %p34_p7, %s1746_s16, %s36_s29  }
  0x13   : > { %178 = sbr.rel (!%p45_p5) target bundleno = 29 (0x1d), region = 24  ;;  %s180_s5 = sand.u32 (%p45_p5), 1, %s1746_s16  }
  0x14   : > { %s1455_s6 = sshll.u32 (%p45_p5), %s1758_s19, 4  ;;  %s1398_s7 = sshll.u32 (%p45_p5), %s180_s5, 6 }
  0x15   : > { %s185_s8 = sadd.s32 (%p45_p5), %s1762_s20, %s1455_s6  ;;  %s182_s13 = scalar_lea.vmem (%p45_p5), [#allocation4], %s1398_s7 }
  0x16   : > { %s1401_s9 = sshll.u32 (%p45_p5), %s185_s8, 3 }
  0x17   : > { %s187_s12 = scalar_lea.vmem (%p45_p5), %s2117_s0, %s1401_s9 }
  0x18   : > { %v230_v0 = vld [vmem:[%s187_s12] sm:$0xff]  ;;  %v232_v1 = vld [vmem:[%s187_s12 + $0x10] sm:$0xff] }
  0x19   : > { %v234_v2 = vld [vmem:[%s187_s12 + $0x20] sm:$0xff]  ;;  %231 = vst [vmem:[%s182_s13] sm:$0xff] %v230_v0  ;;  %233 = vst [vmem:[%s182_s13 + $0x8] sm:$0xff] %v232_v1  ;;  %v236_v3 = vld [vmem:[%s187_s12 + $0x30] sm:$0xff] }
  0x1a   : > { %235 = vst [vmem:[%s182_s13 + $0x10] sm:$0xff] %v234_v2  ;;  %v238_v4 = vld [vmem:[%s187_s12 + $0x40] sm:$0xff]  ;;  %v240_v5 = vld [vmem:[%s187_s12 + $0x50] sm:$0xff]  ;;  %237 = vst [vmem:[%s182_s13 + $0x18] sm:$0xff] %v236_v3 }
  0x1b   : > { %239 = vst [vmem:[%s182_s13 + $0x20] sm:$0xff] %v238_v4  ;;  %241 = vst [vmem:[%s182_s13 + $0x28] sm:$0xff] %v240_v5  ;;  %v242_v6 = vld [vmem:[%s187_s12 + $0x60] sm:$0xff]  ;;  %v244_v7 = vld [vmem:[%s187_s12 + $0x70] sm:$0xff] }
  0x1c   : > { %243 = vst [vmem:[%s182_s13 + $0x30] sm:$0xff] %v242_v6  ;;  %245 = vst [vmem:[%s182_s13 + $0x38] sm:$0xff] %v244_v7 }
  0x1d PF: > { %p1402_p9 = scmp.ge.s32.totalorder %s1766_s21, 1  ;;  %p257_p10 = scmp.lt.s32.totalorder %s1766_s21, 9 }
  0x1f   : > { %p258_p11 = pnand %p1402_p9, %p257_p10 }
  0x20   : > { %s264_s14 = sand.u32 (!%p258_p11), 1, %s1742_s15   ;;  %p297_p12 = scmp.lt.s32.totalorder (!%p258_p11), %s1754_s18, 1 }
  0x21   : > { %261 = sbr.rel (%p258_p11) target bundleno = 4664 (0x1238), region = 66  ;;  %s1403_s24 = sshll.u32 (!%p258_p11), %s264_s14, 6 }
  0x22   : > { %s1874_s6 = scalar_lea.vmem (!%p258_p11), [#allocation4], %s1403_s24  ;;  %s1876_s7 = scalar_lea.vmem (!%p258_p11), [#allocation5], %s1403_s24 }
  0x23   : > { %s1878_s8 = scalar_lea.vmem (!%p258_p11), [#allocation6], %s1403_s24  ;;  %p1407_p13 = scmp.ne.s32.totalorder (!%p258_p11), %s1750_s17, 0 }
  0x26   : > { %s298_s25 = scalar_select %p297_p12, %s1754_s18, 1 }
  0x27   : > { %306 = sbr.rel (%p1407_p13) target bundleno = 46 (0x2e), region = 74 }
  0x28   : > { %s1406_s27 = sshll.u32 %s298_s25, 3 }
  0x29   : > { %s1872_s5 = scalar_lea.vmem %s2118_s1, %s1406_s27 }
  0x2c   : > { %vm307_vm0 = vcmask 261120   ;;  %v1768_v8 = vmov 0.0  }
  0x2d   : > { %308 = vst.msk [vmem:[#allocation2] sm:$0xff] %vm307_vm0, %v1768_v8  ;;  %309 = vst.msk [vmem:[#allocation3] sm:$0xff] %vm307_vm0, %v1768_v8 }
  0x2e PF: > { %v1884_v9 = vld [vmem:[%s2119_s2 + $0x18] sm:$0xff]  ;;  %v1769_v10 = vmov 0.0   ;;  %v1890_v11 = vld [vmem:[%s2119_s2 + $0x10] sm:$0xff]  ;;  %vm1770_vm1 = vmmov 0   ;;  %v1900_v12 = vld [vmem:[%s2119_s2 + $0x8] sm:$0xff]  ;;  %vm318_vm2 = vcmask 261120  }
  0x2f   : > { %1498 = vmatprep.subr.mxu0 %v1769_v10  ;;  %1506 = vmatprep.mubr.msk.f32.mxu0 %vm1770_vm1, %v1769_v10  ;;  %v1909_v13 = vld [vmem:[%s2119_s2] sm:$0xff]  ;;  %v317_v15 = vld [vmem:[%s1874_s6] sm:$0xff]  ;;  %s1771_s25 = smov 64   ;;  %s1772_s27 = smov 32   ;;  %v1410_v34 = vld [vmem:[%s1874_s6 + $0x8] sm:$0xff] }
  0x30   : > { %1499 = vmatpush3.msra.mxu0 %v1884_v9  ;;  %1509 = vmatprep.subr.mxu1 %v1769_v10  ;;  %v1937_v25 = vld [vmem:[%s1872_s5] sm:$0xff]  ;;  %s1773_s28 = smov 96   ;;  %v1420_v4 = vld [vmem:[%s1874_s6 + $0x18] sm:$0xff]  ;;  %s1456_s29 = sshll.u32 (%p1847_p6), %s1750_s17, 4 }
  0x31   : > { %1500 = vmatprep.subr.mxu0 %v1769_v10  ;;  %1510 = vmatpush3.msra.mxu1 %v1884_v9  ;;  %v1415_v51 = vld [vmem:[%s1874_s6 + $0x10] sm:$0xff]  ;;  %s1147_s5 = sadd.s32 (%p1847_p6), %s1754_s18, %s1456_s29 }
  0x32   : > { %1501 = vmatpush3.msra.mxu0 %v1890_v11  ;;  %1511 = vmatprep.subr.mxu1 %v1769_v10 }
  0x33   : > { %1502 = vmatprep.subr.mxu0 %v1769_v10  ;;  %1512 = vmatpush3.msra.mxu1 %v1890_v11 }
  0x34   : > { %1503 = vmatpush3.msra.mxu0 %v1900_v12  ;;  %v315_v14 = vld [vmem:[#allocation2] sm:$0xff]  ;;  %1513 = vmatprep.subr.mxu1 %v1769_v10  ;;  %v316_v24 = vld [vmem:[#allocation3] sm:$0xff] }
  0x35   : > { %1504 = vmatprep.subr.mxu0 %v1769_v10  ;;  %1514 = vmatpush3.msra.mxu1 %v1900_v12 }
  0x36   : > { %1505 = vmatpush3.msra.mxu0 %v1909_v13  ;;  %1515 = vmatprep.subr.mxu1 %v1769_v10 }
  0x37   : > { %1507 = vmatmul.mubr.msk.f32.vlgmr.msra.gmra.mxu0 %vm318_vm2, %v315_v14  ;;  %1516 = vmatpush3.msra.mxu1 %v1909_v13 }
  0x38   : > { %1517 = vmatprep.mubr.msk.f32.mxu1 %vm1770_vm1, %v1769_v10  ;;  %1520 = vmatprep.subr.mxu0 %v1769_v10 }
  0x39   : > { %1521 = vmatpush3.msra.mxu0 %v1884_v9  ;;  %1528 = vmatprep.mubr.msk.f32.mxu0 %vm1770_vm1, %v1769_v10 }
  0x3a   : > { %1522 = vmatprep.subr.mxu0 %v1769_v10  ;;  %1531 = vmatprep.subr.mxu1 %v1769_v10 }
  0x3b   : > { %1523 = vmatpush3.msra.mxu0 %v1890_v11 }
  0x3c   : > { %1524 = vmatprep.subr.mxu0 %v1769_v10 }
  0x3d   : > { %1525 = vmatpush3.msra.mxu0 %v1900_v12 }
  0x3e   : > { %1526 = vmatprep.subr.mxu0 %v1769_v10 }
  0x3f   : > { %1527 = vmatpush3.msra.mxu0 %v1909_v13 }
  0x40   : > { %1542 = vmatprep.subr.mxu0 %v1769_v10 }
  0xf7   : > { %v388_v16 = vpop.f32.mrf.mxu0 }
  0xf8   : > { %v389_v17 = vadd.f32 %v388_v16, %v317_v15 }
  0xf9   : > { %v1508_v18 = vpop.f32.mrf.mxu0 }
  0xfa   : > { %1648 = vtanh.f32 %v389_v17  ;;  %v1409_v20 = vmul.f32 -1.442695, %v389_v17 }
  0xfc   : > { %1650 = vpow2.f32 %v1409_v20 }
 0x107   : > { %v1649_v19 = vpop.eup %1648 }
 0x108   : > { %401 = vrot.lane.b32.xlu0 %v1649_v19, %s1771_s25 }
 0x109   : > { %v1651_v21 = vpop.eup %1650 }
 0x10a   : > { %v395_v22 = vadd.f32 1.0, %v1651_v21 }
 0x10c   : > { %1652 = vrcp.f32 %v395_v22 }
 0x119   : > { %v1653_v23 = vpop.eup %1652 }
 0x11a   : > { %v398_v27 = vmul.f32 %v1653_v23, %v316_v24 }
 0x17a   : > { %v402_v26 = vpop.permute.xlu0 %401 }
 0x17b   : > { %v404_v28 = vmul.f32 %v402_v26, %v1937_v25 }
 0x17d   : > { %v405_v29 = vadd.f32 %v404_v28, %v398_v27  ;;  %v1425_v27 = vld [vmem:[%s1874_s6 + $0x20] sm:$0xff] }
 0x17f   : > { %1654 = vtanh.f32 %v405_v29  ;;  %417 = vst.msk [vmem:[%s1878_s8] sm:$0xff] %vm318_vm2, %v405_v29 }
 0x18c   : > { %v1655_v30 = vpop.eup %1654 }
 0x18d   : > { %408 = vrot.lane.b32.xlu0 %v1655_v30, %s1772_s27 }
 0x1ff   : > { %v409_v31 = vpop.permute.xlu0 %408 }
 0x200   : > { %v411_v32 = vmul.f32 %v1653_v23, %v409_v31 }
 0x202   : > { %413 = vrot.lane.b32.xlu1 %v411_v32, %s1773_s28 }
 0x274   : > { %v414_v33 = vpop.permute.xlu1 %413 }
 0x275   : > { %416 = vst.msk [vmem:[%s1876_s7] sm:$0xff] %vm318_vm2, %v414_v33  ;;  %1518 = vmatmul.mubr.msk.f32.vlgmr.msra.gmra.mxu1 %vm318_vm2, %v414_v33 }
 0x276   : > { %1532 = vmatpush3.msra.mxu1 %v1884_v9  ;;  %1539 = vmatprep.mubr.msk.f32.mxu1 %vm1770_vm1, %v1769_v10 }
 0x277   : > { %1533 = vmatprep.subr.mxu1 %v1769_v10 }
 0x278   : > { %1534 = vmatpush3.msra.mxu1 %v1890_v11 }
 0x279   : > { %1535 = vmatprep.subr.mxu1 %v1769_v10 }
 0x27a   : > { %1536 = vmatpush3.msra.mxu1 %v1900_v12 }
 0x27b   : > { %1537 = vmatprep.subr.mxu1 %v1769_v10 }
 0x27c   : > { %1538 = vmatpush3.msra.mxu1 %v1909_v13 }
 0x27d   : > { %1553 = vmatprep.subr.mxu1 %v1769_v10 }
 0x335   : > { %v488_v35 = vpop.f32.mrf.mxu1 }
 0x336   : > { %v489_v36 = vadd.f32 %v1410_v34, %v488_v35 }
 0x337   : > { %v1519_v37 = vpop.f32.mrf.mxu1 }
 0x338   : > { %1656 = vtanh.f32 %v489_v36  ;;  %v1412_v39 = vmul.f32 -1.442695, %v489_v36 }
 0x33a   : > { %1658 = vpow2.f32 %v1412_v39 }
 0x345   : > { %v1657_v38 = vpop.eup %1656 }
 0x346   : > { %501 = vrot.lane.b32.xlu1 %v1657_v38, %s1771_s25 }
 0x347   : > { %v1659_v40 = vpop.eup %1658 }
 0x348   : > { %v495_v41 = vadd.f32 1.0, %v1659_v40 }
 0x34a   : > { %1660 = vrcp.f32 %v495_v41 }
 0x357   : > { %v1661_v42 = vpop.eup %1660 }
 0x358   : > { %v498_v44 = vmul.f32 %v1661_v42, %v405_v29 }
 0x3b8   : > { %v502_v43 = vpop.permute.xlu1 %501 }
 0x3b9   : > { %v504_v45 = vmul.f32 %v502_v43, %v1937_v25 }
 0x3bb   : > { %v505_v46 = vadd.f32 %v504_v45, %v498_v44  ;;  %v1430_v44 = vld [vmem:[%s1874_s6 + $0x28] sm:$0xff] }
 0x3bd   : > { %1662 = vtanh.f32 %v505_v46  ;;  %1414 = vst.msk [vmem:[%s1878_s8 + $0x8] sm:$0xff] %vm318_vm2, %v505_v46 }
 0x3ca   : > { %v1663_v47 = vpop.eup %1662 }
 0x3cb   : > { %508 = vrot.lane.b32.xlu0 %v1663_v47, %s1772_s27 }
 0x43d   : > { %v509_v48 = vpop.permute.xlu0 %508 }
 0x43e   : > { %v511_v49 = vmul.f32 %v1661_v42, %v509_v48 }
 0x440   : > { %513 = vrot.lane.b32.xlu1 %v511_v49, %s1773_s28 }
 0x4b2   : > { %v514_v50 = vpop.permute.xlu1 %513 }
 0x4b3   : > { %1413 = vst.msk [vmem:[%s1876_s7 + $0x8] sm:$0xff] %vm318_vm2, %v514_v50  ;;  %1529 = vmatmul.mubr.msk.f32.vlgmr.msra.gmra.mxu0 %vm318_vm2, %v514_v50 }
 0x4b4   : > { %1543 = vmatpush3.msra.mxu0 %v1884_v9  ;;  %1550 = vmatprep.mubr.msk.f32.mxu0 %vm1770_vm1, %v1769_v10 }
 0x4b5   : > { %1544 = vmatprep.subr.mxu0 %v1769_v10 }
 0x4b6   : > { %1545 = vmatpush3.msra.mxu0 %v1890_v11 }
 0x4b7   : > { %1546 = vmatprep.subr.mxu0 %v1769_v10 }
 0x4b8   : > { %1547 = vmatpush3.msra.mxu0 %v1900_v12 }
 0x4b9   : > { %1548 = vmatprep.subr.mxu0 %v1769_v10 }
 0x4ba   : > { %1549 = vmatpush3.msra.mxu0 %v1909_v13 }
 0x4bb   : > { %1564 = vmatprep.subr.mxu0 %v1769_v10 }
 0x573   : > { %v590_v52 = vpop.f32.mrf.mxu0 }
 0x574   : > { %v591_v53 = vadd.f32 %v1415_v51, %v590_v52 }
 0x575   : > { %v1530_v54 = vpop.f32.mrf.mxu0 }
 0x576   : > { %1664 = vtanh.f32 %v591_v53  ;;  %v1417_v56 = vmul.f32 -1.442695, %v591_v53 }
 0x578   : > { %1666 = vpow2.f32 %v1417_v56  ;;  %v1435_v56 = vld [vmem:[%s1874_s6 + $0x30] sm:$0xff] }
 0x583   : > { %v1665_v55 = vpop.eup %1664 }
 0x584   : > { %603 = vrot.lane.b32.xlu0 %v1665_v55, %s1771_s25 }
 0x585   : > { %v1667_v57 = vpop.eup %1666 }
 0x586   : > { %v597_v58 = vadd.f32 1.0, %v1667_v57 }
 0x588   : > { %1668 = vrcp.f32 %v597_v58 }
 0x595   : > { %v1669_v59 = vpop.eup %1668 }
 0x596   : > { %v600_v61 = vmul.f32 %v1669_v59, %v505_v46 }
 0x5f6   : > { %v604_v60 = vpop.permute.xlu0 %603 }
 0x5f7   : > { %v606_v62 = vmul.f32 %v604_v60, %v1937_v25 }
 0x5f9   : > { %v607_v63 = vadd.f32 %v606_v62, %v600_v61 }
 0x5fb   : > { %1670 = vtanh.f32 %v607_v63  ;;  %1419 = vst.msk [vmem:[%s1878_s8 + $0x10] sm:$0xff] %vm318_vm2, %v607_v63 }
 0x608   : > { %v1671_v0 = vpop.eup %1670 }
 0x609   : > { %610 = vrot.lane.b32.xlu1 %v1671_v0, %s1772_s27 }
 0x67b   : > { %v611_v1 = vpop.permute.xlu1 %610 }
 0x67c   : > { %v613_v2 = vmul.f32 %v1669_v59, %v611_v1 }
 0x67e   : > { %615 = vrot.lane.b32.xlu0 %v613_v2, %s1773_s28 }
 0x6f0   : > { %v616_v3 = vpop.permute.xlu0 %615 }
 0x6f1   : > { %1418 = vst.msk [vmem:[%s1876_s7 + $0x10] sm:$0xff] %vm318_vm2, %v616_v3  ;;  %1540 = vmatmul.mubr.msk.f32.vlgmr.msra.gmra.mxu1 %vm318_vm2, %v616_v3 }
 0x6f2   : > { %1554 = vmatpush3.msra.mxu1 %v1884_v9  ;;  %1561 = vmatprep.mubr.msk.f32.mxu1 %vm1770_vm1, %v1769_v10 }
 0x6f3   : > { %1555 = vmatprep.subr.mxu1 %v1769_v10 }
 0x6f4   : > { %1556 = vmatpush3.msra.mxu1 %v1890_v11 }
 0x6f5   : > { %1557 = vmatprep.subr.mxu1 %v1769_v10 }
 0x6f6   : > { %1558 = vmatpush3.msra.mxu1 %v1900_v12 }
 0x6f7   : > { %1559 = vmatprep.subr.mxu1 %v1769_v10 }
 0x6f8   : > { %1560 = vmatpush3.msra.mxu1 %v1909_v13 }
 0x6f9   : > { %1575 = vmatprep.subr.mxu1 %v1769_v10 }
 0x7b1   : > { %v692_v5 = vpop.f32.mrf.mxu1 }
 0x7b2   : > { %v693_v6 = vadd.f32 %v1420_v4, %v692_v5 }
 0x7b3   : > { %v1541_v7 = vpop.f32.mrf.mxu1 }
 0x7b4   : > { %1672 = vtanh.f32 %v693_v6  ;;  %v1422_v14 = vmul.f32 -1.442695, %v693_v6 }
 0x7b6   : > { %1674 = vpow2.f32 %v1422_v14  ;;  %v1440_v14 = vld [vmem:[%s1874_s6 + $0x38] sm:$0xff]  ;;  %s1449_s6 = sshll.u32 (%p1847_p6), %s1147_s5, 3 }
 0x7b7   : > { %s1149_s10 = scalar_lea.vmem (%p1847_p6), %s2120_s3, %s1449_s6 }
 0x7c1   : > { %v1673_v8 = vpop.eup %1672 }
 0x7c2   : > { %705 = vrot.lane.b32.xlu1 %v1673_v8, %s1771_s25 }
 0x7c3   : > { %v1675_v15 = vpop.eup %1674 }
 0x7c4   : > { %v699_v16 = vadd.f32 1.0, %v1675_v15 }
 0x7c6   : > { %1676 = vrcp.f32 %v699_v16 }
 0x7d3   : > { %v1677_v17 = vpop.eup %1676 }
 0x7d4   : > { %v702_v19 = vmul.f32 %v1677_v17, %v607_v63 }
 0x834   : > { %v706_v18 = vpop.permute.xlu1 %705 }
 0x835   : > { %v708_v20 = vmul.f32 %v706_v18, %v1937_v25 }
 0x837   : > { %v709_v21 = vadd.f32 %v708_v20, %v702_v19 }
 0x839   : > { %1678 = vtanh.f32 %v709_v21  ;;  %1424 = vst.msk [vmem:[%s1878_s8 + $0x18] sm:$0xff] %vm318_vm2, %v709_v21 }
 0x846   : > { %v1679_v22 = vpop.eup %1678 }
 0x847   : > { %712 = vrot.lane.b32.xlu0 %v1679_v22, %s1772_s27 }
 0x8b9   : > { %v713_v23 = vpop.permute.xlu0 %712 }
 0x8ba   : > { %v715_v24 = vmul.f32 %v1677_v17, %v713_v23 }
 0x8bc   : > { %717 = vrot.lane.b32.xlu1 %v715_v24, %s1773_s28 }
 0x92e   : > { %v718_v26 = vpop.permute.xlu1 %717 }
 0x92f   : > { %1423 = vst.msk [vmem:[%s1876_s7 + $0x18] sm:$0xff] %vm318_vm2, %v718_v26  ;;  %1551 = vmatmul.mubr.msk.f32.vlgmr.msra.gmra.mxu0 %vm318_vm2, %v718_v26 }
 0x930   : > { %1565 = vmatpush3.msra.mxu0 %v1884_v9  ;;  %1572 = vmatprep.mubr.msk.f32.mxu0 %vm1770_vm1, %v1769_v10 }
 0x931   : > { %1566 = vmatprep.subr.mxu0 %v1769_v10 }
 0x932   : > { %1567 = vmatpush3.msra.mxu0 %v1890_v11 }
 0x933   : > { %1568 = vmatprep.subr.mxu0 %v1769_v10 }
 0x934   : > { %1569 = vmatpush3.msra.mxu0 %v1900_v12 }
 0x935   : > { %1570 = vmatprep.subr.mxu0 %v1769_v10 }
 0x936   : > { %1571 = vmatpush3.msra.mxu0 %v1909_v13 }
 0x9ef   : > { %v794_v28 = vpop.f32.mrf.mxu0 }
 0x9f0   : > { %v795_v29 = vadd.f32 %v1425_v27, %v794_v28 }
 0x9f1   : > { %v1552_v30 = vpop.f32.mrf.mxu0 }
 0x9f2   : > { %1680 = vtanh.f32 %v795_v29  ;;  %v1427_v32 = vmul.f32 -1.442695, %v795_v29 }
 0x9f4   : > { %1682 = vpow2.f32 %v1427_v32  ;;  %v1194_v32 = vld [vmem:[%s1876_s7 + $0x8] sm:$0xff] (%p1847_p6) }
 0x9f5   : > { %1195 = vst [vmem:[%s1149_s10 + $0x10] sm:$0xff] (%p1847_p6), %v1194_v32 }
 0x9ff   : > { %v1681_v31 = vpop.eup %1680 }
 0xa00   : > { %807 = vrot.lane.b32.xlu0 %v1681_v31, %s1771_s25 }
 0xa01   : > { %v1683_v33 = vpop.eup %1682 }
 0xa02   : > { %v801_v34 = vadd.f32 1.0, %v1683_v33  ;;  %v1196_v33 = vld [vmem:[%s1876_s7 + $0x10] sm:$0xff] (%p1847_p6) }
 0xa03   : > { %1197 = vst [vmem:[%s1149_s10 + $0x20] sm:$0xff] (%p1847_p6), %v1196_v33 }
 0xa04   : > { %1684 = vrcp.f32 %v801_v34  ;;  %v1198_v34 = vld [vmem:[%s1876_s7 + $0x18] sm:$0xff] (%p1847_p6) }
 0xa05   : > { %1199 = vst [vmem:[%s1149_s10 + $0x30] sm:$0xff] (%p1847_p6), %v1198_v34 }
 0xa11   : > { %v1685_v35 = vpop.eup %1684 }
 0xa12   : > { %v804_v37 = vmul.f32 %v1685_v35, %v709_v21 }
 0xa72   : > { %v808_v36 = vpop.permute.xlu0 %807 }
 0xa73   : > { %v810_v38 = vmul.f32 %v808_v36, %v1937_v25 }
 0xa75   : > { %v811_v39 = vadd.f32 %v810_v38, %v804_v37 }
 0xa77   : > { %1686 = vtanh.f32 %v811_v39  ;;  %1429 = vst.msk [vmem:[%s1878_s8 + $0x20] sm:$0xff] %vm318_vm2, %v811_v39 }
 0xa84   : > { %v1687_v40 = vpop.eup %1686 }
 0xa85   : > { %814 = vrot.lane.b32.xlu1 %v1687_v40, %s1772_s27 }
 0xaf7   : > { %v815_v41 = vpop.permute.xlu1 %814 }
 0xaf8   : > { %v817_v42 = vmul.f32 %v1685_v35, %v815_v41 }
 0xafa   : > { %819 = vrot.lane.b32.xlu0 %v817_v42, %s1773_s28 }
 0xb6c   : > { %v820_v43 = vpop.permute.xlu0 %819 }
 0xb6d   : > { %1428 = vst.msk [vmem:[%s1876_s7 + $0x20] sm:$0xff] %vm318_vm2, %v820_v43  ;;  %1562 = vmatmul.mubr.msk.f32.vlgmr.msra.gmra.mxu1 %vm318_vm2, %v820_v43 }
 0xb6e   : > { %1576 = vmatpush3.msra.mxu1 %v1884_v9  ;;  %1583 = vmatprep.mubr.msk.f32.mxu1 %vm1770_vm1, %v1769_v10 }
 0xb6f   : > { %1577 = vmatprep.subr.mxu1 %v1769_v10 }
 0xb70   : > { %1578 = vmatpush3.msra.mxu1 %v1890_v11 }
 0xb71   : > { %1579 = vmatprep.subr.mxu1 %v1769_v10 }
 0xb72   : > { %1580 = vmatpush3.msra.mxu1 %v1900_v12 }
 0xb73   : > { %1581 = vmatprep.subr.mxu1 %v1769_v10 }
 0xb74   : > { %1582 = vmatpush3.msra.mxu1 %v1909_v13  ;;  %v1200_v35 = vld [vmem:[%s1876_s7 + $0x20] sm:$0xff] (%p1847_p6) }
 0xb75   : > { %1201 = vst [vmem:[%s1149_s10 + $0x40] sm:$0xff] (%p1847_p6), %v1200_v35 }
 0xc2d   : > { %v896_v45 = vpop.f32.mrf.mxu1 }
 0xc2e   : > { %v897_v46 = vadd.f32 %v1430_v44, %v896_v45 }
 0xc2f   : > { %v1563_v9 = vpop.f32.mrf.mxu1 }
 0xc30   : > { %1688 = vtanh.f32 %v897_v46  ;;  %v1432_v48 = vmul.f32 -1.442695, %v897_v46 }
 0xc32   : > { %1690 = vpow2.f32 %v1432_v48 }
 0xc3d   : > { %v1689_v47 = vpop.eup %1688 }
 0xc3e   : > { %909 = vrot.lane.b32.xlu1 %v1689_v47, %s1771_s25 }
 0xc3f   : > { %v1691_v11 = vpop.eup %1690 }
 0xc40   : > { %v903_v49 = vadd.f32 1.0, %v1691_v11 }
 0xc42   : > { %1692 = vrcp.f32 %v903_v49 }
 0xc4f   : > { %v1693_v12 = vpop.eup %1692 }
 0xc50   : > { %v906_v50 = vmul.f32 %v1693_v12, %v811_v39 }
 0xcb0   : > { %v910_v10 = vpop.permute.xlu1 %909 }
 0xcb1   : > { %v912_v13 = vmul.f32 %v910_v10, %v1937_v25 }
 0xcb3   : > { %v913_v51 = vadd.f32 %v912_v13, %v906_v50 }
 0xcb5   : > { %1694 = vtanh.f32 %v913_v51  ;;  %1434 = vst.msk [vmem:[%s1878_s8 + $0x28] sm:$0xff] %vm318_vm2, %v913_v51 }
 0xcc2   : > { %v1695_v52 = vpop.eup %1694 }
 0xcc3   : > { %916 = vrot.lane.b32.xlu0 %v1695_v52, %s1772_s27 }
 0xd35   : > { %v917_v53 = vpop.permute.xlu0 %916 }
 0xd36   : > { %v919_v54 = vmul.f32 %v1693_v12, %v917_v53 }
 0xd38   : > { %921 = vrot.lane.b32.xlu1 %v919_v54, %s1773_s28 }
 0xdaa   : > { %v922_v55 = vpop.permute.xlu1 %921 }
 0xdab   : > { %1433 = vst.msk [vmem:[%s1876_s7 + $0x28] sm:$0xff] %vm318_vm2, %v922_v55  ;;  %1573 = vmatmul.mubr.msk.f32.vlgmr.msra.gmra.mxu0 %vm318_vm2, %v922_v55 }
 0xdb2   : > { %v1202_v36 = vld [vmem:[%s1876_s7 + $0x28] sm:$0xff] (%p1847_p6) }
 0xdb3   : > { %1203 = vst [vmem:[%s1149_s10 + $0x50] sm:$0xff] (%p1847_p6), %v1202_v36 }
 0xe6b   : > { %v998_v57 = vpop.f32.mrf.mxu0 }
 0xe6c   : > { %v999_v58 = vadd.f32 %v1435_v56, %v998_v57 }
 0xe6d   : > { %v1574_v59 = vpop.f32.mrf.mxu0 }
 0xe6e   : > { %1696 = vtanh.f32 %v999_v58  ;;  %v1437_v61 = vmul.f32 -1.442695, %v999_v58 }
 0xe70   : > { %1698 = vpow2.f32 %v1437_v61 }
 0xe7b   : > { %v1697_v60 = vpop.eup %1696 }
 0xe7c   : > { %1011 = vrot.lane.b32.xlu0 %v1697_v60, %s1771_s25 }
 0xe7d   : > { %v1699_v62 = vpop.eup %1698 }
 0xe7e   : > { %v1005_v63 = vadd.f32 1.0, %v1699_v62 }
 0xe80   : > { %1700 = vrcp.f32 %v1005_v63 }
 0xe8d   : > { %v1701_v0 = vpop.eup %1700 }
 0xe8e   : > { %v1008_v2 = vmul.f32 %v1701_v0, %v913_v51 }
 0xeee   : > { %v1012_v1 = vpop.permute.xlu0 %1011 }
 0xeef   : > { %v1014_v3 = vmul.f32 %v1012_v1, %v1937_v25 }
 0xef1   : > { %v1015_v4 = vadd.f32 %v1014_v3, %v1008_v2 }
 0xef3   : > { %1702 = vtanh.f32 %v1015_v4  ;;  %1439 = vst.msk [vmem:[%s1878_s8 + $0x30] sm:$0xff] %vm318_vm2, %v1015_v4 }
 0xf00   : > { %v1703_v5 = vpop.eup %1702 }
 0xf01   : > { %1018 = vrot.lane.b32.xlu1 %v1703_v5, %s1772_s27 }
 0xf73   : > { %v1019_v6 = vpop.permute.xlu1 %1018 }
 0xf74   : > { %v1021_v7 = vmul.f32 %v1701_v0, %v1019_v6 }
 0xf76   : > { %1023 = vrot.lane.b32.xlu0 %v1021_v7, %s1773_s28 }
 0xfe8   : > { %v1024_v8 = vpop.permute.xlu0 %1023 }
 0xfe9   : > { %1438 = vst.msk [vmem:[%s1876_s7 + $0x30] sm:$0xff] %vm318_vm2, %v1024_v8  ;;  %1584 = vmatmul.mubr.msk.f32.vlgmr.msra.gmra.mxu1 %vm318_vm2, %v1024_v8 }
 0xff0   : > { %v1204_v37 = vld [vmem:[%s1876_s7 + $0x30] sm:$0xff] (%p1847_p6) }
 0xff1   : > { %1205 = vst [vmem:[%s1149_s10 + $0x60] sm:$0xff] (%p1847_p6), %v1204_v37 }
0x10a9   : > { %v1100_v15 = vpop.f32.mrf.mxu1 }
0x10aa   : > { %v1101_v16 = vadd.f32 %v1440_v14, %v1100_v15 }
0x10ab   : > { %v1585_v17 = vpop.f32.mrf.mxu1 }
0x10ac   : > { %1704 = vtanh.f32 %v1101_v16  ;;  %v1442_v19 = vmul.f32 -1.442695, %v1101_v16 }
0x10ae   : > { %1706 = vpow2.f32 %v1442_v19 }
0x10b9   : > { %v1705_v18 = vpop.eup %1704 }
0x10ba   : > { %1113 = vrot.lane.b32.xlu1 %v1705_v18, %s1771_s25 }
0x10bb   : > { %v1707_v20 = vpop.eup %1706 }
0x10bc   : > { %v1107_v21 = vadd.f32 1.0, %v1707_v20 }
0x10be   : > { %1708 = vrcp.f32 %v1107_v21 }
0x10cb   : > { %v1709_v22 = vpop.eup %1708 }
0x10cc   : > { %v1110_v24 = vmul.f32 %v1709_v22, %v1015_v4 }
0x112c   : > { %v1114_v23 = vpop.permute.xlu1 %1113 }
0x112d   : > { %v1116_v26 = vmul.f32 %v1114_v23, %v1937_v25  ;;  %v1192_v25 = vld [vmem:[%s1876_s7] sm:$0xff] (%p1847_p6) }
0x112e   : > { %1193 = vst [vmem:[%s1149_s10] sm:$0xff] (%p1847_p6), %v1192_v25 }
0x112f   : > { %v1117_v27 = vadd.f32 %v1116_v26, %v1110_v24 }
0x1131   : > { %1710 = vtanh.f32 %v1117_v27  ;;  %1444 = vst.msk [vmem:[%s1878_s8 + $0x38] sm:$0xff] %vm318_vm2, %v1117_v27  ;;  %1133 = vst.msk [vmem:[#allocation3] sm:$0xff] %vm318_vm2, %v1117_v27 }
0x113e   : > { %v1711_v28 = vpop.eup %1710 }
0x113f   : > { %1120 = vrot.lane.b32.xlu0 %v1711_v28, %s1772_s27 }
0x11b1   : > { %v1121_v29 = vpop.permute.xlu0 %1120 }
0x11b2   : > { %v1123_v30 = vmul.f32 %v1709_v22, %v1121_v29 }
0x11b4   : > { %1125 = vrot.lane.b32.xlu1 %v1123_v30, %s1773_s28 }
0x1223   : > { %1144 = sbr.rel (!%p1847_p6) target bundleno = 4656 (0x1230), region = 78 }
0x1226   : > { %v1126_v31 = vpop.permute.xlu1 %1125 }
0x1227   : > { %1443 = vst.msk [vmem:[%s1876_s7 + $0x38] sm:$0xff] %vm318_vm2, %v1126_v31  ;;  %1132 = vst.msk [vmem:[#allocation2] sm:$0xff] %vm318_vm2, %v1126_v31 }
0x122e   : > { %v1206_v38 = vld [vmem:[%s1876_s7 + $0x38] sm:$0xff] }
0x122f   : > { %1207 = vst [vmem:[%s1149_s10 + $0x70] sm:$0xff] %v1206_v38 }
0x1230 PF: > { %1213 = sbr.rel (!%p1847_p6) target bundleno = 4664 (0x1238), region = 116  ;;  %s1457_s7 = sshll.u32 (%p1847_p6), %s1750_s17, 4  ;;  %v1261_v39 = vld [vmem:[%s1878_s8] sm:$0xff] (%p1847_p6)  ;;  %v1263_v40 = vld [vmem:[%s1878_s8 + $0x8] sm:$0xff] (%p1847_p6)  ;;  %v1265_v41 = vld [vmem:[%s1878_s8 + $0x10] sm:$0xff] (%p1847_p6) }
0x1231   : > { %s1216_s11 = sadd.s32 (%p1847_p6), %s1754_s18, %s1457_s7  ;;  %v1267_v42 = vld [vmem:[%s1878_s8 + $0x18] sm:$0xff] (%p1847_p6)  ;;  %v1269_v43 = vld [vmem:[%s1878_s8 + $0x20] sm:$0xff] (%p1847_p6)  ;;  %v1271_v44 = vld [vmem:[%s1878_s8 + $0x28] sm:$0xff] (%p1847_p6) }
0x1232   : > { %s1452_s26 = sshll.u32 (%p1847_p6), %s1216_s11, 3  ;;  %v1273_v45 = vld [vmem:[%s1878_s8 + $0x30] sm:$0xff] (%p1847_p6)  ;;  %v1275_v46 = vld [vmem:[%s1878_s8 + $0x38] sm:$0xff] (%p1847_p6) }
0x1233   : > { %s1218_s14 = scalar_lea.vmem (%p1847_p6), %s2121_s4, %s1452_s26 }
0x1234   : > { %1262 = vst [vmem:[%s1218_s14] sm:$0xff] (%p1847_p6), %v1261_v39  ;;  %1264 = vst [vmem:[%s1218_s14 + $0x10] sm:$0xff] (%p1847_p6), %v1263_v40 }
0x1235   : > { %1266 = vst [vmem:[%s1218_s14 + $0x20] sm:$0xff] %v1265_v41  ;;  %1268 = vst [vmem:[%s1218_s14 + $0x30] sm:$0xff] %v1267_v42 }
0x1236   : > { %1270 = vst [vmem:[%s1218_s14 + $0x40] sm:$0xff] %v1269_v43  ;;  %1272 = vst [vmem:[%s1218_s14 + $0x50] sm:$0xff] %v1271_v44 }
0x1237   : > { %1274 = vst [vmem:[%s1218_s14 + $0x60] sm:$0xff] %v1273_v45  ;;  %1276 = vst [vmem:[%s1218_s14 + $0x70] sm:$0xff] %v1275_v46 }
0x1238 PF: > { %s15_s21 = sadd.s32 1, %s1766_s21   ;;  %s2123_s15 = smov %s1746_s16 }
0x1239   : > { %p12_p0 = scmp.ge.s32.totalorder %s15_s21, 10   ;;  %s2124_s16 = smov %s1855_s30 }
0x123a   : > { %s2125_s17 = smov %s1758_s19  ;;  %s2126_s18 = smov %s1762_s20 }
0x123b   : > { %s2127_s19 = smov %s2130_s22  ;;  %s2128_s20 = smov %s2134_s23 }
0x123c   :  { %14 = sbr.rel (!%p12_p0) target bundleno = 4 (0x4), region = 221 }

</bundles_post_ra>
